<compile_context>
chip_gen: v7x
topology: tpu7x:2x2x1
jax: 0.10.0
libtpu: 0.0.40
codegen_flags: <defaults>
</compile_context>

<pallas_src>
import math

import jax
import jax.numpy as jnp
from jax.experimental import pallas as pl
from jax.experimental.pallas import tpu as pltpu

EPS = 1e-8
LANES = 128          # lane width (fixed by hardware vreg layout)
SUBLANE = 8          # sublane granularity
TR_TARGET = 1024     # sublanes per block -> 128K points / ~3.5 MiB per block


def _round_up(x, m):
    return ((x + m - 1) // m) * m


def _infinite_pos_kernel(pos_ref, out_ref):
    # pos_ref: (3, TR, 128) f32   out_ref: (4, TR, 128) f32
    x = pos_ref[0]
    y = pos_ref[1]
    z = pos_ref[2]
    r = jnp.sqrt(x * x + y * y + z * z)          # (TR, 128) elementwise VPU
    inv_r = pl.reciprocal(r + EPS)               # exact 1/(r+eps)
    out_ref[0] = x * inv_r
    out_ref[1] = y * inv_r
    out_ref[2] = z * inv_r
    out_ref[3] = r * pl.reciprocal(1.0 + r)      # r / (1 + r)


def _encode_pos(pos_3d, tr):
    # pos_3d: (3, R_pad, 128) float32, R_pad % tr == 0, tr % 8 == 0
    three, r_pad, lanes = pos_3d.shape
    assert three == 3 and lanes == LANES and r_pad % tr == 0
    return pl.pallas_call(
        _infinite_pos_kernel,
        out_shape=jax.ShapeDtypeStruct((4, r_pad, LANES), pos_3d.dtype),
        grid=(r_pad // tr,),
        in_specs=[pl.BlockSpec((3, tr, LANES), lambda i: (0, i, 0))],
        out_specs=pl.BlockSpec((4, tr, LANES), lambda i: (0, i, 0)),
        compiler_params=pltpu.CompilerParams(
            dimension_semantics=("parallel",)),
    )(pos_3d)


def infinite_volume_encoder_forward(samples, context=None):
    """JAX/Pallas equivalent of InfiniteVolumeEncoder.forward.

    samples:
      'sampled_point_xyz'          : (..., 3) float32
      'sampled_point_ray_direction': (..., 3) float32
      'sampled_point_distance'     : (...)    float32
    Returns dict with 'pos' of shape (..., 4), plus pass-through 'ray'/'dists'
    (and 'context' when precompute() supplied one).
    """
    pos = samples['sampled_point_xyz'].astype(jnp.float32)
    lead_shape = pos.shape[:-1]
    n = math.prod(lead_shape) if lead_shape else 1

    # choose tiling: point index -> (R, 128); R padded to a multiple of TR
    r = pl.cdiv(n, LANES)
    tr = min(TR_TARGET, _round_up(r, SUBLANE))
    r_pad = _round_up(r, tr)
    n_pad = r_pad * LANES

    # channel-major repack: (N, 3) -> (3, N) -> pad -> (3, R_pad, 128)
    pos_ct = pos.reshape(n, 3).T
    if n_pad != n:
        # zero padding is harmless: 0/(0+eps)=0 and 0/(1+0)=0, rows sliced off
        pos_ct = jnp.pad(pos_ct, ((0, 0), (0, n_pad - n)))
    pos_3d = pos_ct.reshape(3, r_pad, LANES)

    out_3d = _encode_pos(pos_3d, tr)                       # (4, R_pad, 128)
    pos_out = out_3d.reshape(4, n_pad)[:, :n].T.reshape(*lead_shape, 4)

    out = {
        'pos': pos_out,
        'ray': samples['sampled_point_ray_direction'],
        'dists': samples['sampled_point_distance'],
    }
    if context is not None:
        out['context'] = context
    return out


def _reference_forward(samples):
    pos = samples['sampled_point_xyz']
    r = jnp.sqrt(jnp.sum(pos * pos, axis=-1, keepdims=True))
    return {
        'pos': jnp.concatenate([pos / (r + EPS), r / (1.0 + r)], axis=-1),
        'ray': samples['sampled_point_ray_direction'],
        'dists': samples['sampled_point_distance'],
    }


def _make_samples(key, lead_shape):
    k1, k2, k3 = jax.random.split(key, 3)
    return {
        'sampled_point_xyz':
            jax.random.normal(k1, (*lead_shape, 3), jnp.float32) * 3.0,
        'sampled_point_ray_direction':
            jax.random.normal(k2, (*lead_shape, 3), jnp.float32),
        'sampled_point_distance':
            jax.random.uniform(k3, lead_shape, jnp.float32),
    }


if __name__ == "__main__":
    key = jax.random.PRNGKey(0)
    k_a, k_b = jax.random.split(key, 2)

    # case 1: exact multiple of lane width (8*16 = 128 points)
    samples_a = _make_samples(k_a, (8, 16))
    # case 2: ragged point count to exercise padding (5*7 = 35 points)
    samples_b = _make_samples(k_b, (5, 7))

    for samples, lead in ((samples_a, (8, 16)), (samples_b, (5, 7))):
        out = infinite_volume_encoder_forward(samples)
        jax.block_until_ready(out['pos'])

        ref = _reference_forward(samples)
        assert out['pos'].shape == (*lead, 4)
        assert jnp.allclose(out['pos'], ref['pos'], atol=1e-5, rtol=1e-5)
        assert jnp.array_equal(out['ray'], ref['ray'])
        assert jnp.array_equal(out['dists'], ref['dists'])

    print("KERNEL_OK")
</pallas_src>

<mosaic_0001>
module attributes {stable_mosaic.version = 11 : i64} {
  func.func @_infinite_pos_kernel(%arg0: i32, %arg1: memref<3x8x128xf32, #tpu.memory_space<vmem>>, %arg2: memref<4x8x128xf32, #tpu.memory_space<vmem>>) attributes {dimension_semantics = [#tpu.dimension_semantics<parallel>], iteration_bounds = array<i64: 1>, scalar_prefetch = 0 : i64, scratch_operands = 0 : i64, tpu.core_type = #tpu.core_type<tc>, window_params = [{transform_indices = @transform_0, window_bounds = array<i64: 3, 8, 128>}, {transform_indices = @transform_1, window_bounds = array<i64: 4, 8, 128>}]} {
    %c0 = arith.constant 0 : index
    %c0_0 = arith.constant 0 : index
    %c0_1 = arith.constant 0 : index
    %0 = vector.load %arg1[%c0, %c0_0, %c0_1] : memref<3x8x128xf32, #tpu.memory_space<vmem>>, vector<1x8x128xf32>
    %1 = vector.shape_cast %0 : vector<1x8x128xf32> to vector<8x128xf32>
    %c1 = arith.constant 1 : index
    %c0_2 = arith.constant 0 : index
    %c0_3 = arith.constant 0 : index
    %2 = vector.load %arg1[%c1, %c0_2, %c0_3] : memref<3x8x128xf32, #tpu.memory_space<vmem>>, vector<1x8x128xf32>
    %3 = vector.shape_cast %2 : vector<1x8x128xf32> to vector<8x128xf32>
    %c2 = arith.constant 2 : index
    %c0_4 = arith.constant 0 : index
    %c0_5 = arith.constant 0 : index
    %4 = vector.load %arg1[%c2, %c0_4, %c0_5] : memref<3x8x128xf32, #tpu.memory_space<vmem>>, vector<1x8x128xf32>
    %5 = vector.shape_cast %4 : vector<1x8x128xf32> to vector<8x128xf32>
    %6 = arith.mulf %1, %1 : vector<8x128xf32>
    %7 = arith.mulf %3, %3 : vector<8x128xf32>
    %8 = arith.addf %6, %7 : vector<8x128xf32>
    %9 = arith.mulf %5, %5 : vector<8x128xf32>
    %10 = arith.addf %8, %9 : vector<8x128xf32>
    %11 = math.sqrt %10 : vector<8x128xf32>
    %cst = arith.constant 9.99999993E-9 : f32
    %12 = vector.broadcast %cst : f32 to vector<8x128xf32>
    %13 = arith.addf %11, %12 : vector<8x128xf32>
    %14 = tpu.reciprocal %13 : vector<8x128xf32> -> vector<8x128xf32>
    %15 = arith.mulf %1, %14 : vector<8x128xf32>
    %c0_6 = arith.constant 0 : index
    %c0_7 = arith.constant 0 : index
    %c0_8 = arith.constant 0 : index
    %16 = vector.load %arg2[%c0_6, %c0_7, %c0_8] : memref<4x8x128xf32, #tpu.memory_space<vmem>>, vector<1x8x128xf32>
    %17 = vector.shape_cast %16 : vector<1x8x128xf32> to vector<8x128xf32>
    %18 = vector.shape_cast %15 : vector<8x128xf32> to vector<1x8x128xf32>
    tpu.vector_store %arg2[%c0_6, %c0_7, %c0_8], %18 {strides = array<i32>} : memref<4x8x128xf32, #tpu.memory_space<vmem>>, vector<1x8x128xf32>,
    %19 = arith.mulf %3, %14 : vector<8x128xf32>
    %c1_9 = arith.constant 1 : index
    %c0_10 = arith.constant 0 : index
    %c0_11 = arith.constant 0 : index
    %20 = vector.load %arg2[%c1_9, %c0_10, %c0_11] : memref<4x8x128xf32, #tpu.memory_space<vmem>>, vector<1x8x128xf32>
    %21 = vector.shape_cast %20 : vector<1x8x128xf32> to vector<8x128xf32>
    %22 = vector.shape_cast %19 : vector<8x128xf32> to vector<1x8x128xf32>
    tpu.vector_store %arg2[%c1_9, %c0_10, %c0_11], %22 {strides = array<i32>} : memref<4x8x128xf32, #tpu.memory_space<vmem>>, vector<1x8x128xf32>,
    %23 = arith.mulf %5, %14 : vector<8x128xf32>
    %c2_12 = arith.constant 2 : index
    %c0_13 = arith.constant 0 : index
    %c0_14 = arith.constant 0 : index
    %24 = vector.load %arg2[%c2_12, %c0_13, %c0_14] : memref<4x8x128xf32, #tpu.memory_space<vmem>>, vector<1x8x128xf32>
    %25 = vector.shape_cast %24 : vector<1x8x128xf32> to vector<8x128xf32>
    %26 = vector.shape_cast %23 : vector<8x128xf32> to vector<1x8x128xf32>
    tpu.vector_store %arg2[%c2_12, %c0_13, %c0_14], %26 {strides = array<i32>} : memref<4x8x128xf32, #tpu.memory_space<vmem>>, vector<1x8x128xf32>,
    %cst_15 = arith.constant 1.000000e+00 : f32
    %27 = vector.broadcast %cst_15 : f32 to vector<8x128xf32>
    %28 = arith.addf %27, %11 : vector<8x128xf32>
    %29 = tpu.reciprocal %28 : vector<8x128xf32> -> vector<8x128xf32>
    %30 = arith.mulf %11, %29 : vector<8x128xf32>
    %c3 = arith.constant 3 : index
    %c0_16 = arith.constant 0 : index
    %c0_17 = arith.constant 0 : index
    %31 = vector.load %arg2[%c3, %c0_16, %c0_17] : memref<4x8x128xf32, #tpu.memory_space<vmem>>, vector<1x8x128xf32>
    %32 = vector.shape_cast %31 : vector<1x8x128xf32> to vector<8x128xf32>
    %33 = vector.shape_cast %30 : vector<8x128xf32> to vector<1x8x128xf32>
    tpu.vector_store %arg2[%c3, %c0_16, %c0_17], %33 {strides = array<i32>} : memref<4x8x128xf32, #tpu.memory_space<vmem>>, vector<1x8x128xf32>,
    return
  }
  func.func @transform_0(%arg0: i32) -> (i32, i32, i32) {
    %c0_i32 = arith.constant 0 : i32
    %c0_i32_0 = arith.constant 0 : i32
    %c0_i32_1 = arith.constant 0 : i32
    return %c0_i32, %arg0, %c0_i32_0 : i32, i32, i32
  }
  func.func @transform_1(%arg0: i32) -> (i32, i32, i32) {
    %c0_i32 = arith.constant 0 : i32
    %c0_i32_0 = arith.constant 0 : i32
    %c0_i32_1 = arith.constant 0 : i32
    return %c0_i32, %arg0, %c0_i32_0 : i32, i32, i32
  }
}

</mosaic_0001>

<bundles_post_ra>
// kernel: tpu_custom_call.1
= control target key start
LH: loop header
LB: loop body
LE: loop exit
PB: predicated region body
PF: predicated region fallthrough
CT: control target
= control target key end

     0   :  { %6 = vsyncpa [#allocation3], 0  ;;  %s174_s0 = inlined_call_operand.hbm [shape: f32[3,8,128], index: 0, kind: input, shape index: {}]   ;;  %s175_s1 = inlined_call_operand.hbm [shape: f32[4,8,128], index: 1, kind: output, shape index: {}]  }
   0x1   :  { %7 = vsyncpa [#allocation4], 0  ;;  %s130_s6 = smov [#allocation2]   ;;  %s82_s10 = scalar_lea.hbm %s174_s0, 384 }
   0x2   :  { %s13_s7 = sshll.u32 %s130_s6, 4  ;;  %p83_p0 = scmp.ne.s32.totalorder %s174_s0, %s82_s10  ;;  %s14_s7 = int_to_ptr.vmem [resolvable:$true] %s13_s7 }
   0x3   :  { %p86_p1 = scmp.lt.u32.totalorder %s82_s10, %s174_s0 }
   0x5   :  { %p88_p2 = pnand %p86_p1, %p83_p0 }
   0x7   :  { %91 = shalt.err (!%p88_p2)
}
   0x8   :  { %s92_s15 = scalar_lea.vmem %s14_s7, 384  ;;  %p97_p4 = scmp.lt.s32.totalorder %s14_s7, %s14_s7 }
   0x9   :  { %p93_p3 = scmp.ne.s32.totalorder %s14_s7, %s92_s15  ;;  %p98_p5 = scmp.lt.s32.totalorder %s92_s15, %s92_s15 }
   0xb   :  { %p99_p6 = por %p98_p5, %p97_p4 }
   0xd   :  { %p100_p7 = pnand %p99_p6, %p93_p3 }
   0xf   :  { %103 = shalt.err (!%p100_p7)
}
  0x10   :  { %s131_s16 = smov 128   ;;  %s132_s17 = smov 8  }
  0x11   :  { %19 = dma.hbm_to_vmem [thread:$0]  %s174_s0, 384, %s14_s7, [#allocation3], %s131_s16, %s131_s16, %s132_s17  }
  0x12   :  { %126 = dma.done.wait [#allocation3], 384  }
  0x13   :  { %127 = vsyncadd [#allocation3], 4294966912  ;;  %v23_v0 = vld [vmem:[#allocation2] sm:$0xff]  ;;  %v25_v1 = vld [vmem:[#allocation2 + $0x8] sm:$0xff]  ;;  %s133_s0 = smov [#allocation5]  }
  0x14   :  { %v27_v2 = vld [vmem:[#allocation2 + $0x10] sm:$0xff]  ;;  %v28_v3 = vmul.f32 %v23_v0, %v23_v0  ;;  %v29_v4 = vmul.f32 %v25_v1, %v25_v1  ;;  %s60_s20 = sshll.u32 %s133_s0, 4  ;;  %s61_s20 = int_to_ptr.vmem [resolvable:$true] %s60_s20 }
  0x15   :  { %v31_v5 = vmul.f32 %v27_v2, %v27_v2  ;;  %s104_s21 = scalar_lea.vmem %s61_s20, 512  ;;  %p109_p9 = scmp.lt.s32.totalorder %s61_s20, %s61_s20 }
  0x16   :  { %v30_v6 = vadd.f32 %v29_v4, %v28_v3  ;;  %p105_p8 = scmp.ne.s32.totalorder %s61_s20, %s104_s21  ;;  %p110_p10 = scmp.lt.s32.totalorder %s104_s21, %s104_s21 }
  0x18   :  { %v32_v7 = vadd.f32 %v31_v5, %v30_v6  ;;  %p111_p11 = por %p110_p10, %p109_p9 }
  0x1a   :  { %76 = vrsqrt.f32 %v32_v7  ;;  %vm35_vm0 = vcmp.eq.f32.partialorder %v32_v7, inf  ;;  %v38_v9 = vand.u32 2147483648, %v32_v7  ;;  %vm37_vm1 = vcmp.eq.f32.partialorder %v32_v7, 0.0  ;;  %p112_p12 = pnand %p111_p11, %p105_p8 }
  0x24   :  { %v77_v8 = vpop.eup %76 }
  0x25   :  { %v34_v10 = vmul.f32 %v77_v8, %v32_v7 }
  0x27   :  { %v36_v11 = vsel %vm35_vm0, %v32_v7, %v34_v10 }
  0x28   :  { %v39_v12 = vsel %vm37_vm1, %v38_v9, %v36_v11 }
  0x29   :  { %v40_v13 = vadd.f32 1e-08, %v39_v12  ;;  %v50_v14 = vadd.f32 1.0, %v39_v12 }
  0x2b   :  { %78 = vrcp.f32 %v40_v13 }
  0x2c   :  { %80 = vrcp.f32 %v50_v14 }
  0x35   :  { %v79_v15 = vpop.eup %78 }
  0x36   :  { %v81_v16 = vpop.eup %80  ;;  %v42_v17 = vmul.f32 %v79_v15, %v23_v0  ;;  %v44_v18 = vmul.f32 %v79_v15, %v25_v1  ;;  %v47_v19 = vmul.f32 %v79_v15, %v27_v2 }
  0x37   :  { %v52_v20 = vmul.f32 %v81_v16, %v39_v12 }
  0x38   :  { %43 = vst [vmem:[#allocation5] sm:$0xff] %v42_v17  ;;  %46 = vst [vmem:[#allocation5 + $0x8] sm:$0xff] %v44_v18 }
  0x39   :  { %49 = vst [vmem:[#allocation5 + $0x10] sm:$0xff] %v47_v19  ;;  %54 = vst [vmem:[#allocation5 + $0x18] sm:$0xff] %v52_v20 }
  0x3a   :  { %115 = shalt.err (!%p112_p12)
}
  0x3b   :  { %s116_s24 = scalar_lea.hbm %s175_s1, 512 }
  0x3c   :  { %p117_p13 = scmp.ne.s32.totalorder %s175_s1, %s116_s24  ;;  %p120_p0 = scmp.lt.u32.totalorder %s116_s24, %s175_s1 }
  0x3e   :  { %p122_p1 = pnand %p120_p0, %p117_p13 }
  0x40   :  { %125 = shalt.err (!%p122_p1)
}
  0x41   :  { %66 = dma.vmem_to_hbm [thread:$0]  %s61_s20, 512, %s175_s1, [#allocation4], %s131_s16, %s131_s16, %s132_s17  }
  0x42   :  { %128 = dma.done.wait [#allocation4], 512  }
  0x43   :  { %129 = vsyncadd [#allocation4], 4294966784 }
  0x44   :  { %70 = vsyncpa [#allocation3], 1 }
  0x45   :  { %71 = vsyncpa [#allocation4], 1 }

</bundles_post_ra>
